<compile_context>
chip_gen: v7x
topology: tpu7x:2x2x1
jax: 0.10.0
libtpu: 0.0.40
codegen_flags: <defaults>
</compile_context>

<pallas_src>
import functools

import jax
import jax.numpy as jnp
from jax import lax
from jax.experimental import pallas as pl
from jax.experimental.pallas import tpu as pltpu


def _round_up(x, m):
    return ((x + m - 1) // m) * m


def _vmem_ceiling_bytes():
    """Per-generation usable VMEM ceiling (leave headroom for compiler scratch)."""
    try:
        cap = int(pltpu.get_tpu_info().vmem_capacity_bytes)
    except Exception:
        cap = 64 * 1024 * 1024  # conservative (v7x physical)
    return max(16 * 1024 * 1024, (cap * 3) // 4)


def _const_block_spec(shape, index_map):
    """BlockSpec for a constant-index (resident) operand, single-buffered.

    Its index_map never changes, so the second pipeline buffer is wasted VMEM.
    Falls back to the default (double-buffered) spec if this JAX version's
    BlockSpec does not accept pipeline_mode.  Returns (spec, buffer_count).
    """
    try:
        return pl.BlockSpec(shape, index_map, pipeline_mode=pl.Buffered(1)), 1
    except Exception:
        return pl.BlockSpec(shape, index_map), 2


def _plan_tiling(n, k, f, itemsize, k_pad, x_bufs, vmem_ceiling):
    """Pick (tile_n, k_win, vmem_limit) from a full working-set VMEM budget."""
    f_lanes = _round_up(max(f, 1), 128)
    onehot_cap = 2 * 1024 * 1024     # keep the materialized one-hot small
    headroom = 2 * 1024 * 1024
    grid_min = 2 if n >= 1024 else 1  # keep >=2 steps so both v7x TCs get work

    def k_window(tile_n):
        # Window of sorted-X rows that can contribute to one output row tile:
        # at most min(tile_n, k) unique hits, plus 128 for start alignment.
        return min(k_pad, _round_up(max(min(tile_n, k), 1), 128) + 128)

    def working_set(tile_n, k_win):
        x_bytes = k_pad * f_lanes * itemsize * x_bufs          # resident X
        pos_bytes = tile_n * 128 * 4 * 2                       # (tile_n,1) i32, lane-padded, dbl-buf
        out_bytes = tile_n * f_lanes * itemsize * 2            # output tile, dbl-buf
        onehot_bytes = tile_n * k_win * (itemsize + 4)         # one-hot + iota
        xwin_bytes = k_win * f_lanes * itemsize                # sliced X window value
        acc_bytes = tile_n * f_lanes * 4                       # f32 matmul result
        return x_bytes + pos_bytes + out_bytes + onehot_bytes + xwin_bytes + acc_bytes

    chosen = None
    for t in (2048, 1024, 512, 256, 128, 64, 32, 16, 8):
        tile_n = n if t >= n else t                            # full dim is always legal
        k_win = k_window(tile_n)
        if tile_n > 8:
            if pl.cdiv(n, tile_n) < grid_min:
                continue
            if tile_n * k_win * (itemsize + 4) > onehot_cap:
                continue
            if working_set(tile_n, k_win) + headroom > vmem_ceiling:
                continue
        chosen = (tile_n, k_win)
        break
    if chosen is None:
        tile_n = n if n <= 8 else 8
        chosen = (tile_n, k_window(tile_n))

    tile_n, k_win = chosen
    ws = working_set(tile_n, k_win)
    vmem_limit = min(vmem_ceiling, int(ws * 5 // 4) + 4 * 1024 * 1024)
    vmem_limit = max(vmem_limit, 16 * 1024 * 1024)
    return tile_n, k_win, vmem_limit


def _unpool_kernel(k_win, starts_ref, pos_ref, x_ref, out_ref):
    # starts_ref : SMEM (num_tiles,) int32   128-aligned window start per tile
    # pos_ref    : VMEM (tile_n, 1) int32    node -> row position in X (or -1)
    # x_ref      : VMEM (k_pad, f)           X rows (sorted-by-idx order), zero-padded
    # out_ref    : VMEM (tile_n, f)
    tile_n = out_ref.shape[0]
    s = pl.multiple_of(starts_ref[pl.program_id(0)], 128)
    # onehot[r, j] = 1 iff the global X-row position (s + j) is the source row
    # of output row r.  Each output row matches at most one column -> the
    # scatter becomes one lane-dense MXU matmul with full-tile stores.
    cols = lax.broadcasted_iota(jnp.int32, (tile_n, k_win), 1) + s
    onehot = (cols == pos_ref[...]).astype(x_ref.dtype)
    x_win = x_ref[pl.ds(s, k_win), :]
    out_ref[...] = jnp.dot(
        onehot, x_win, preferred_element_type=jnp.float32
    ).astype(out_ref.dtype)


def graph_unpool(A, X, idx):
    """Pallas implementation of GraphUnpool.forward(A, X, idx)."""
    n = A.shape[0]
    X = jnp.asarray(X)
    idx = jnp.asarray(idx).reshape(-1).astype(jnp.int32)
    k, f = X.shape
    dtype = X.dtype
    itemsize = jnp.dtype(dtype).itemsize

    k_pad = _round_up(max(k, 1), 128)
    vmem_ceiling = _vmem_ceiling_bytes()

    # Resident X spec (constant index_map) -> single-buffered when supported.
    x_spec, x_bufs = _const_block_spec((k_pad, f), lambda i, st: (0, 0))

    tile_n, k_win, vmem_limit = _plan_tiling(
        n, k, f, itemsize, k_pad, x_bufs, vmem_ceiling)
    num_tiles = pl.cdiv(n, tile_n)
    needs_window = k_win < k_pad

    if needs_window:
        # Sort idx so the X rows feeding one output row-tile are contiguous;
        # per-tile 128-aligned window starts are scalar-prefetched.
        order = jnp.argsort(idx)
        idx_s = idx[order]
        x_src = X[order]
        tile_starts = jnp.arange(num_tiles, dtype=jnp.int32) * tile_n
        lo = jnp.searchsorted(idx_s, tile_starts).astype(jnp.int32)
        starts = jnp.clip((lo // 128) * 128, 0, k_pad - k_win).astype(jnp.int32)
    else:
        # Window covers all of X: no sort / permute needed (typical AGSR case).
        idx_s = idx
        x_src = X
        starts = jnp.zeros((num_tiles,), dtype=jnp.int32)

    # Inverse map: node id -> source row in x_src, or -1 (stays a zero row).
    pos = jnp.full((n,), -1, dtype=jnp.int32).at[idx_s].set(
        jnp.arange(k, dtype=jnp.int32))
    pos = pos.reshape(n, 1)
    x_p = jnp.pad(x_src, ((0, k_pad - k), (0, 0)))  # zero rows never selected

    cost = pl.CostEstimate(
        flops=2 * int(num_tiles) * tile_n * k_win * f,
        transcendentals=0,
        bytes_accessed=n * f * itemsize + k_pad * f * itemsize + n * 4
        + int(num_tiles) * 4,
    )

    grid_spec = pltpu.PrefetchScalarGridSpec(
        num_scalar_prefetch=1,
        grid=(int(num_tiles),),
        in_specs=[
            pl.BlockSpec((tile_n, 1), lambda i, st: (i, 0)),  # pos row-tile
            x_spec,                                           # X resident in VMEM
        ],
        out_specs=pl.BlockSpec((tile_n, f), lambda i, st: (i, 0)),
    )

    out = pl.pallas_call(
        functools.partial(_unpool_kernel, k_win),
        out_shape=jax.ShapeDtypeStruct((n, f), dtype),
        grid_spec=grid_spec,
        compiler_params=pltpu.CompilerParams(
            dimension_semantics=("parallel",),
            vmem_limit_bytes=int(vmem_limit),
        ),
        cost_estimate=cost,
    )(starts, pos, x_p)

    # A is returned untouched (it never enters VMEM), exactly like the PyTorch module.
    return A, out


if __name__ == "__main__":
    key = jax.random.PRNGKey(0)
    k_a, k_x, k_idx, k_a2, k_x2, k_idx2 = jax.random.split(key, 6)

    # Small shapes consistent with the module (N nodes, K pooled nodes, F features).
    N, K, F = 16, 8, 32
    A = jax.random.normal(k_a, (N, N), dtype=jnp.float32)
    X = jax.random.normal(k_x, (K, F), dtype=jnp.float32)
    idx = jax.random.permutation(k_idx, jnp.arange(N, dtype=jnp.int32))[:K]

    A_out, new_X = graph_unpool(A, X, idx)
    jax.block_until_ready((A_out, new_X))

    ref = jnp.zeros((N, F), dtype=X.dtype).at[idx].set(X)
    assert new_X.shape == (N, F), "output shape mismatch"
    assert jnp.allclose(new_X, ref), "mismatch vs reference scatter (small)"
    assert jnp.allclose(A_out, A), "A must pass through unchanged"

    # Moderate shapes: exercises the sorted / windowed-contraction path.
    N2, K2, F2 = 1536, 640, 96
    A2 = jax.random.normal(k_a2, (N2, N2), dtype=jnp.float32)
    X2 = jax.random.normal(k_x2, (K2, F2), dtype=jnp.float32)
    idx2 = jax.random.permutation(k_idx2, jnp.arange(N2, dtype=jnp.int32))[:K2]

    _, new_X2 = graph_unpool(A2, X2, idx2)
    jax.block_until_ready(new_X2)
    ref2 = jnp.zeros((N2, F2), dtype=X2.dtype).at[idx2].set(X2)
    assert jnp.allclose(new_X2, ref2), "mismatch vs reference scatter (windowed)"

    print("KERNEL_OK")
</pallas_src>

<mosaic_0001>
module attributes {stable_mosaic.version = 11 : i64} {
  func.func @_unpool_kernel(%arg0: i32, %arg1: memref<1xi32, #tpu.memory_space<smem>>, %arg2: memref<16x1xi32, #tpu.memory_space<vmem>>, %arg3: memref<128x32xf32, #tpu.memory_space<vmem>>, %arg4: memref<16x32xf32, #tpu.memory_space<vmem>>) attributes {dimension_semantics = [#tpu.dimension_semantics<parallel>], iteration_bounds = array<i64: 1>, scalar_prefetch = 1 : i64, scratch_operands = 0 : i64, tpu.core_type = #tpu.core_type<tc>, window_params = [{transform_indices = @transform_0, window_bounds = array<i64: 16, 1>}, {pipeline_mode = #tpu.pipeline_mode<synchronous>, transform_indices = @transform_1, window_bounds = array<i64: 128, 32>}, {transform_indices = @transform_2, window_bounds = array<i64: 16, 32>}]} {
    %0 = arith.index_cast %arg0 : i32 to index
    %1 = memref.load %arg1[%0] : memref<1xi32, #tpu.memory_space<smem>>
    %2 = tpu.assume_multiple %1, 128 : i32
    %3 = tpu.iota {dimensions = array<i32: 1>} : vector<16x128xi32>
    %4 = vector.broadcast %2 : i32 to vector<16x128xi32>
    %5 = arith.addi %3, %4 : vector<16x128xi32>
    %c0 = arith.constant 0 : index
    %c0_0 = arith.constant 0 : index
    %6 = vector.load %arg2[%c0, %c0_0] : memref<16x1xi32, #tpu.memory_space<vmem>>, vector<16x1xi32>
    %7 = vector.broadcast %6 : vector<16x1xi32> to vector<16x128xi32>
    %8 = arith.cmpi eq, %5, %7 : vector<16x128xi32>
    %9 = arith.extui %8 : vector<16x128xi1> to vector<16x128xi32>
    %10 = arith.sitofp %9 : vector<16x128xi32> to vector<16x128xf32>
    %11 = arith.index_cast %2 : i32 to index
    %c0_1 = arith.constant 0 : index
    %12 = vector.load %arg3[%11, %c0_1] : memref<128x32xf32, #tpu.memory_space<vmem>>, vector<128x32xf32>
    %cst = arith.constant dense<0.000000e+00> : vector<16x32xf32>
    %13 = tpu.matmul %10, %12, %cst {dimension_numbers = #tpu.dot_dimension_numbers<[1], [0], [0], [1], [0, 0, 1, 1], [], []>} : vector<16x128xf32>, vector<128x32xf32>, vector<16x32xf32> -> vector<16x32xf32>
    %c0_2 = arith.constant 0 : index
    %c0_3 = arith.constant 0 : index
    %14 = vector.load %arg4[%c0_2, %c0_3] : memref<16x32xf32, #tpu.memory_space<vmem>>, vector<16x32xf32>
    tpu.vector_store %arg4[%c0_2, %c0_3], %13 {strides = array<i32>} : memref<16x32xf32, #tpu.memory_space<vmem>>, vector<16x32xf32>,
    return
  }
  func.func @transform_0(%arg0: i32, %arg1: memref<1xi32, #tpu.memory_space<smem>>) -> (i32, i32) {
    %c0_i32 = arith.constant 0 : i32
    %c0_i32_0 = arith.constant 0 : i32
    return %arg0, %c0_i32 : i32, i32
  }
  func.func @transform_1(%arg0: i32, %arg1: memref<1xi32, #tpu.memory_space<smem>>) -> (i32, i32) {
    %c0_i32 = arith.constant 0 : i32
    %c0_i32_0 = arith.constant 0 : i32
    %c0_i32_1 = arith.constant 0 : i32
    return %c0_i32, %c0_i32_0 : i32, i32
  }
  func.func @transform_2(%arg0: i32, %arg1: memref<1xi32, #tpu.memory_space<smem>>) -> (i32, i32) {
    %c0_i32 = arith.constant 0 : i32
    %c0_i32_0 = arith.constant 0 : i32
    return %arg0, %c0_i32 : i32, i32
  }
}

</mosaic_0001>

<bundles_post_ra>
// kernel: tpu_custom_call.1
= control target key start
LH: loop header
LB: loop body
LE: loop exit
PB: predicated region body
PF: predicated region fallthrough
CT: control target
= control target key end

     0   :  { %s334_s0 = inlined_call_operand.<no memory space> [shape: s32[1], index: 0, kind: input, shape index: {}]   ;;  %s335_s1 = inlined_call_operand.vmem [shape: s32[16,1], index: 1, kind: input, shape index: {}]   ;;  %s336_s2 = inlined_call_operand.vmem [shape: f32[128,32], index: 2, kind: input, shape index: {}]   ;;  %s337_s3 = inlined_call_operand.hbm [shape: f32[16,32], index: 3, kind: output, shape index: {}]  }
   0x1   :  { %v19_v0 = vld [vmem:[%s335_s1] sm:$0xff]  ;;  %s298_s18 = scalar_lea.vmem %s336_s2, %s334_s0 }
   0x2   :  { %9 = vsyncpa [#allocation5], 0  ;;  %v264_v1 = vmov 0   ;;  %v34_v2 = vld [vmem:[%s298_s18] sm:$0xff]  ;;  %v35_v3 = vld [vmem:[%s298_s18 + $0x8] sm:$0xff]  ;;  %v15_v27 = vlaneseq  ;;  %v17_v29 = vstv %s334_s0  ;;  %v265_v32 = vmov 1.0  }
   0x3   :  { %239 = vset.pattern.permute.xlu0 %v264_v1  ;;  %v36_v4 = vld [vmem:[%s298_s18 + $0x10] sm:$0xff]  ;;  %v202_v5 = vpack.c.bf16 %v35_v3, %v34_v2  ;;  %v37_v6 = vld [vmem:[%s298_s18 + $0x18] sm:$0xff]  ;;  %v20_v7 = vld [vmem:[%s335_s1 + $0x8] sm:$0xff]  ;;  %s266_s21 = smov [#allocation4]   ;;  %vm125_vm2 = vcmask 261120  }
   0x4   :  { %22 = vperm.xlu0 %239, %v19_v0   ;;  %v206_v8 = vpack.c.bf16 %v37_v6, %v36_v4  ;;  %v38_v9 = vld [vmem:[%s298_s18 + $0x20] sm:$0xff]  ;;  %v39_v10 = vld [vmem:[%s298_s18 + $0x28] sm:$0xff]  ;;  %v40_v12 = vld [vmem:[%s298_s18 + $0x30] sm:$0xff]  ;;  %v16_v28 = vand.u32 127, %v15_v27  ;;  %s133_s22 = sshll.u32 %s266_s21, 4  ;;  %s134_s22 = int_to_ptr.vmem [resolvable:$true] %s133_s22 }
   0x5   :  { %203 = vmatprep.subr.bf16.mxu0 %v202_v5  ;;  %v210_v11 = vpack.c.bf16 %v39_v10, %v38_v9  ;;  %v41_v13 = vld [vmem:[%s298_s18 + $0x38] sm:$0xff]  ;;  %v42_v15 = vld [vmem:[%s298_s18 + $0x40] sm:$0xff]  ;;  %v43_v16 = vld [vmem:[%s298_s18 + $0x48] sm:$0xff]  ;;  %s240_s23 = scalar_lea.vmem %s134_s22, 256  ;;  %p245_p1 = scmp.lt.s32.totalorder %s134_s22, %s134_s22 }
   0x6   :  { %205 = vmatpush3.bf16.msra.mxu0 %v202_v5  ;;  %v214_v14 = vpack.c.bf16 %v41_v13, %v40_v12  ;;  %v218_v17 = vpack.c.bf16 %v43_v16, %v42_v15  ;;  %v44_v18 = vld [vmem:[%s298_s18 + $0x50] sm:$0xff]  ;;  %v45_v19 = vld [vmem:[%s298_s18 + $0x58] sm:$0xff]  ;;  %v46_v21 = vld [vmem:[%s298_s18 + $0x60] sm:$0xff]  ;;  %v18_v30 = vadd.s32 %v17_v29, %v16_v28  ;;  %p241_p0 = scmp.ne.s32.totalorder %s134_s22, %s240_s23  ;;  %p246_p2 = scmp.lt.s32.totalorder %s240_s23, %s240_s23 }
   0x7   :  { %207 = vmatprep.subr.bf16.mxu0 %v206_v8  ;;  %v222_v20 = vpack.c.bf16 %v45_v19, %v44_v18  ;;  %v47_v22 = vld [vmem:[%s298_s18 + $0x68] sm:$0xff]  ;;  %v48_v24 = vld [vmem:[%s298_s18 + $0x70] sm:$0xff]  ;;  %v49_v25 = vld [vmem:[%s298_s18 + $0x78] sm:$0xff] }
   0x8   :  { %25 = vperm.xlu0 %239, %v20_v7   ;;  %v226_v23 = vpack.c.bf16 %v47_v22, %v46_v21  ;;  %v230_v26 = vpack.c.bf16 %v49_v25, %v48_v24  ;;  %p247_p3 = por %p246_p2, %p245_p1 }
   0xa   :  { %209 = vmatpush3.bf16.msra.mxu0 %v206_v8  ;;  %p248_p4 = pnand %p247_p3, %p241_p0 }
   0xb   :  { %211 = vmatprep.subr.bf16.mxu0 %v210_v11 }
   0xe   :  { %213 = vmatpush3.bf16.msra.mxu0 %v210_v11 }
   0xf   :  { %215 = vmatprep.subr.bf16.mxu0 %v214_v14 }
  0x12   :  { %217 = vmatpush3.bf16.msra.mxu0 %v214_v14 }
  0x13   :  { %219 = vmatprep.subr.bf16.mxu0 %v218_v17 }
  0x16   :  { %221 = vmatpush3.bf16.msra.mxu0 %v218_v17 }
  0x17   :  { %223 = vmatprep.subr.bf16.mxu0 %v222_v20 }
  0x1a   :  { %225 = vmatpush3.bf16.msra.mxu0 %v222_v20 }
  0x1b   :  { %227 = vmatprep.subr.bf16.mxu0 %v226_v23 }
  0x1e   :  { %229 = vmatpush3.bf16.msra.mxu0 %v226_v23 }
  0x1f   :  { %231 = vmatprep.subr.bf16.mxu0 %v230_v26 }
  0x22   :  { %233 = vmatpush3.bf16.msra.mxu0 %v230_v26 }
  0x83   :  { %v23_v31 = vpop.permute.xlu0 %22 }
  0x84   :  { %vm27_vm0 = vcmp.eq.s32.totalorder %v18_v30, %v23_v31 }
  0x85   :  { %199 = vmatprep.mubr.msk.f32.mxu0 %vm27_vm0, %v265_v32 }
  0x87   :  { %v26_v33 = vpop.permute.xlu0 %25 }
  0x88   :  { %vm28_vm1 = vcmp.eq.s32.totalorder %v18_v30, %v26_v33 }
  0x89   :  { %200 = vmatmul.mubr.msk.f32.vlgmr.msra.gmra.mrb[0].mxu0 %vm28_vm1, %v265_v32 }
 0x15c   :  { %v201_v34 = vpop.f32.mrb[0].mxu0 }
 0x15d   :  { %127 = vst.msk [vmem:[#allocation4 + $0x8] sm:$0xff] %vm125_vm2, %v201_v34  ;;  %v116_v35 = vpop.f32.mrb[1].mxu0 }
 0x15e   :  { %126 = vst.msk [vmem:[#allocation4] sm:$0xff] %vm125_vm2, %v116_v35 }
 0x15f   :  { %251 = shalt.err (!%p248_p4)
}
 0x160   :  { %s252_s25 = scalar_lea.hbm %s337_s3, 256 }
 0x161   :  { %p253_p5 = scmp.ne.s32.totalorder %s337_s3, %s252_s25  ;;  %p256_p6 = scmp.lt.u32.totalorder %s252_s25, %s337_s3 }
 0x163   :  { %p258_p7 = pnand %p256_p6, %p253_p5 }
 0x165   :  { %261 = shalt.err (!%p258_p7)
}
 0x166   :  { %s267_s30 = smov 128   ;;  %s268_s4 = smov 8  }
 0x167   :  { %139 = dma.vmem_to_hbm [thread:$0]  %s134_s22, 256, %s337_s3, [#allocation5], %s267_s30, %s267_s30, %s268_s4  }
 0x168   :  { %262 = dma.done.wait [#allocation5], 256  }
 0x169   :  { %263 = vsyncadd [#allocation5], 4294967040 }
 0x16a   :  { %143 = vsyncpa [#allocation5], 1 }

</bundles_post_ra>
